<compile_context>
chip_gen: v7x
topology: tpu7x:2x2x1
jax: 0.10.0
libtpu: 0.0.40
codegen_flags: <defaults>
</compile_context>

<pallas_src>
import functools

import jax
import jax.numpy as jnp
from jax import lax
from jax.experimental import pallas as pl
from jax.experimental.pallas import tpu as pltpu


# ----------------------------- Pallas kernel -------------------------------
def _upcatconv_kernel(xin_ref, w1_ref, w2_ref, b1_ref, b2_ref, o_ref, y1p,
                      *, H, Nb):
    """Fused DoubleConv on Nb halo-padded images stacked along rows.

    xin_ref : (Nb*(H+2), W*Cin) f32   concat([x2, x1_up]) on lanes; halo rows zero
    w1_ref  : (3*W*Cin, W*Cm)  bf16   conv1 banded weights (3 vertical taps on K)
    w2_ref  : (3*W*Cm, W*Cout) bf16   conv2 banded weights
    b1_ref  : (1, W*Cm)   f32         bias tiled over W
    b2_ref  : (1, W*Cout) f32
    o_ref   : (Nb*(H+2), W*Cout)      rows h in [0,H) of every (H+2)-row block valid
    y1p     : VMEM (Nb*(H+2), W*Cm) f32  halo-padded intermediate (never leaves VMEM)
    """
    S = H + 2                         # rows per image incl. top/bottom halo
    R = Nb * S                        # rows in this block
    M = R - 2                         # rows that have a full 3-row window
    Lm = y1p.shape[1]
    Lo = o_ref.shape[1]

    # ---- conv1: ONE MXU matmul, K = 3*W*Cin (vertical taps folded into K). ----
    win1 = jnp.concatenate(
        [xin_ref[pl.ds(dy, M), :] for dy in range(3)], axis=-1
    ).astype(jnp.bfloat16)                                   # (M, 3*W*Cin)
    y1 = jnp.dot(win1, w1_ref[...], preferred_element_type=jnp.float32)
    y1 = y1 + b1_ref[...]
    y1 = jnp.maximum(y1, 0.2 * y1)                           # LeakyReLU(0.2)

    # ---- halo-padded intermediate stays entirely in VMEM. ----
    y1p[pl.ds(1, M), :] = y1                                 # data (+ junk) rows
    zrow = jnp.zeros((1, Lm), jnp.float32)
    y1p[pl.ds(0, 1), :] = zrow                               # top halo, image 0
    y1p[pl.ds(R - 1, 1), :] = zrow                           # bottom halo, last image
    # Rows computed across image boundaries are junk and land exactly on the
    # halo rows conv2 must see as zero: overwrite the Nb-1 interior row pairs.
    zpair = jnp.zeros((2, Lm), jnp.float32)
    for b in range(Nb - 1):
        y1p[pl.ds(b * S + H + 1, 2), :] = zpair

    # ---- conv2: ONE MXU matmul, K = 3*W*Cm. ----
    win2 = jnp.concatenate(
        [y1p[pl.ds(dy, M), :] for dy in range(3)], axis=-1
    ).astype(jnp.bfloat16)                                   # (M, 3*W*Cm)
    y2 = jnp.dot(win2, w2_ref[...], preferred_element_type=jnp.float32)
    y2 = y2 + b2_ref[...]
    y2 = jnp.maximum(y2, 0.2 * y2)

    # Full-lane-width stores; the 2 trailing don't-care rows are written as 0.
    o_ref[pl.ds(0, M), :] = y2.astype(o_ref.dtype)
    o_ref[pl.ds(M, 2), :] = jnp.zeros((2, Lo), o_ref.dtype)


# ------------------------- banded weight construction ------------------------
def _conv_band_weights(w, W):
    """w: (3, 3, Ci, Co) HWIO -> (3, W*Ci, W*Co) banded matrices.

    band[dy][p*Ci + ci, q*Co + co] = w[dy, p-q+1, ci, co] for |p-q| <= 1, else 0,
    so a SAME 3x3 conv becomes  out[h] = sum_dy  x_pad_rows[h+dy] @ band[dy]
    on (rows, W*Ci) slabs (W-direction zero padding is absorbed by the band).
    """
    _, _, Ci, Co = w.shape
    bands = []
    for dy in range(3):
        band = jnp.zeros((W * Ci, W * Co), w.dtype)
        for dx in range(3):
            eye = jnp.eye(W, W, k=1 - dx, dtype=w.dtype)     # 1 at [q+dx-1, q]
            band = band + jnp.kron(eye, w[dy, dx])
        bands.append(band)
    return jnp.stack(bands)


def _pick_batch_block(n, rows_per_image, max_nb=8):
    """Largest Nb dividing n whose row block is 8-row aligned (or covers the
    whole array), preferring >= 2 grid steps so both v7x TensorCores get work."""
    cands = [d for d in range(1, min(n, max_nb) + 1)
             if n % d == 0 and ((d * rows_per_image) % 8 == 0 or d == n)]
    if not cands:
        return n
    pref = [d for d in cands if n // d >= 2]
    return max(pref) if pref else max(cands)


# ----------------------------- wrapper (forward) -----------------------------
def up_cat_conv_forward(x1, x2, params, *, max_batch_block=8):
    """x1: (N, C1, H1, W1) NCHW, x2: (N, C2, H2, W2) NCHW -> (N, Cout, H2, W2)."""
    N, C1, H1, W1 = x1.shape
    _, C2, H2, W2 = x2.shape
    w1, b1 = params["w1"], params["b1"]
    w2, b2 = params["w2"], params["b2"]
    Cin = C1 + C2
    Cm, Cout = w1.shape[-1], w2.shape[-1]

    H1u, W1u = 2 * H1, 2 * W1
    diffY, diffX = H2 - H1u, W2 - W1u
    assert diffY >= 0 and diffX >= 0, "negative pad (crop) not supported"

    # channel-repeat x4 + PixelShuffle(2): pure tile/reshape/transpose (no gather).
    x1r = jnp.tile(x1, (1, 4, 1, 1))                         # (N, 4C1, H1, W1)
    x1u = x1r.reshape(N, C1, 2, 2, H1, W1)
    x1u = jnp.transpose(x1u, (0, 1, 4, 2, 5, 3)).reshape(N, C1, H1u, W1u)
    x1u = jnp.pad(x1u, ((0, 0), (0, 0),
                        (diffY // 2, diffY - diffY // 2),
                        (diffX // 2, diffX - diffX // 2)))   # diff pad (no-op here)

    # NCHW -> lane-dense (N, H, W*C); channel concat on lanes; halo rows padded
    # here so every kernel store is full-lane-width and unmasked.
    x2f = jnp.transpose(x2, (0, 2, 3, 1)).reshape(N, H2, W2 * C2)
    x1f = jnp.transpose(x1u, (0, 2, 3, 1)).reshape(N, H2, W2 * C1)
    xin = jnp.concatenate([x2f, x1f], axis=-1)               # (N, H, W*Cin)
    xin = jnp.pad(xin, ((0, 0), (1, 1), (0, 0)))             # zero halo rows
    xin = xin.reshape(N * (H2 + 2), W2 * Cin)                # flat, f32

    # Banded weights; conv1's channel concat is absorbed by stacking the x2 and
    # x1 band slices along K, and the 3 vertical taps are stacked along K too.
    w1_band = jnp.concatenate(
        [_conv_band_weights(w1[:, :, :C2, :], W2),
         _conv_band_weights(w1[:, :, C2:, :], W2)], axis=1)  # (3, W*Cin, W*Cm)
    w1s = w1_band.reshape(3 * W2 * Cin, W2 * Cm).astype(jnp.bfloat16)
    w2s = _conv_band_weights(w2, W2).reshape(
        3 * W2 * Cm, W2 * Cout).astype(jnp.bfloat16)
    b1t = jnp.tile(b1, W2).reshape(1, W2 * Cm).astype(jnp.float32)
    b2t = jnp.tile(b2, W2).reshape(1, W2 * Cout).astype(jnp.float32)

    S = H2 + 2
    Nb = _pick_batch_block(N, S, max_batch_block)
    R = Nb * S
    steps = N // Nb
    M = R - 2

    flops = steps * 2 * M * ((3 * W2 * Cin) * (W2 * Cm)
                             + (3 * W2 * Cm) * (W2 * Cout))
    bytes_accessed = (N * S * W2 * Cin * 4 + N * S * W2 * Cout * 4
                      + 3 * W2 * Cin * W2 * Cm * 2
                      + 3 * W2 * Cm * W2 * Cout * 2
                      + W2 * (Cm + Cout) * 4)

    kernel = functools.partial(_upcatconv_kernel, H=H2, Nb=Nb)

    out_flat = pl.pallas_call(
        kernel,
        out_shape=jax.ShapeDtypeStruct((N * S, W2 * Cout), x2.dtype),
        grid=(steps,),
        in_specs=[
            pl.BlockSpec((R, W2 * Cin), lambda n: (n, 0)),
            pl.BlockSpec((3 * W2 * Cin, W2 * Cm), lambda n: (0, 0)),
            pl.BlockSpec((3 * W2 * Cm, W2 * Cout), lambda n: (0, 0)),
            pl.BlockSpec((1, W2 * Cm), lambda n: (0, 0)),
            pl.BlockSpec((1, W2 * Cout), lambda n: (0, 0)),
        ],
        out_specs=pl.BlockSpec((R, W2 * Cout), lambda n: (n, 0)),
        scratch_shapes=[pltpu.VMEM((R, W2 * Cm), jnp.float32)],
        compiler_params=pltpu.CompilerParams(
            dimension_semantics=("parallel",)),
        cost_estimate=pl.CostEstimate(
            flops=flops, transcendentals=0, bytes_accessed=bytes_accessed),
    )(xin, w1s, w2s, b1t, b2t)

    # (N*(H+2), W*Cout) -> drop per-image halo/junk rows -> NCHW.
    out = out_flat.reshape(N, S, W2, Cout)[:, :H2]
    return jnp.transpose(out, (0, 3, 1, 2))


# ------------------------- pure-JAX reference check -------------------------
def _ref_forward(x1, x2, params):
    N, C1, H1, W1 = x1.shape
    # PixelShuffle(2) of cat([x1]*4, dim=1) via the explicit index map
    # (independent construction from the kernel path).
    c = jnp.arange(C1)[:, None, None]
    i = jnp.arange(2)[None, :, None]
    j = jnp.arange(2)[None, None, :]
    src = (4 * c + 2 * i + j) % C1                           # (C1, 2, 2)
    g = x1[:, src]                                           # (N, C1, 2, 2, H1, W1)
    x1u = jnp.transpose(g, (0, 1, 4, 2, 5, 3)).reshape(N, C1, 2 * H1, 2 * W1)
    diffY = x2.shape[2] - x1u.shape[2]
    diffX = x2.shape[3] - x1u.shape[3]
    x1u = jnp.pad(x1u, ((0, 0), (0, 0),
                        (diffY // 2, diffY - diffY // 2),
                        (diffX // 2, diffX - diffX // 2)))
    x = jnp.concatenate([x2, x1u], axis=1)
    x = jnp.transpose(x, (0, 2, 3, 1))
    dn = ("NHWC", "HWIO", "NHWC")
    y = lax.conv_general_dilated(x, params["w1"], (1, 1), "SAME",
                                 dimension_numbers=dn,
                                 precision=lax.Precision.HIGHEST) + params["b1"]
    y = jnp.maximum(y, 0.2 * y)
    y = lax.conv_general_dilated(y, params["w2"], (1, 1), "SAME",
                                 dimension_numbers=dn,
                                 precision=lax.Precision.HIGHEST) + params["b2"]
    y = jnp.maximum(y, 0.2 * y)
    return jnp.transpose(y, (0, 3, 1, 2))


if __name__ == "__main__":
    key = jax.random.PRNGKey(0)
    k1, k2, kw1, kb1, kw2, kb2 = jax.random.split(key, 6)

    # x1: low-res features, x2: skip connection (UNet decoder step).
    N, C1, H1, W1 = 8, 4, 8, 8
    C2, H2, W2 = 4, 16, 16
    in_channels = C1 + C2            # 8 channels feed the DoubleConv
    out_channels = 8

    x1 = jax.random.normal(k1, (N, C1, H1, W1), jnp.float32)
    x2 = jax.random.normal(k2, (N, C2, H2, W2), jnp.float32)

    params = {
        "w1": 0.1 * jax.random.normal(kw1, (3, 3, in_channels, out_channels),
                                      jnp.float32),
        "b1": 0.1 * jax.random.normal(kb1, (out_channels,), jnp.float32),
        "w2": 0.1 * jax.random.normal(kw2, (3, 3, out_channels, out_channels),
                                      jnp.float32),
        "b2": 0.1 * jax.random.normal(kb2, (out_channels,), jnp.float32),
    }

    fwd = jax.jit(up_cat_conv_forward)
    out = jax.block_until_ready(fwd(x1, x2, params))

    # Reference at matched operand precision (kernel uses bf16 MXU operands,
    # f32 accumulation / bias / activation).
    rb = lambda a: a.astype(jnp.bfloat16).astype(jnp.float32)
    ref_params = {"w1": rb(params["w1"]), "b1": params["b1"],
                  "w2": rb(params["w2"]), "b2": params["b2"]}
    ref = jax.block_until_ready(
        jax.jit(_ref_forward)(rb(x1), rb(x2), ref_params))

    assert out.shape == (N, out_channels, H2, W2), out.shape
    max_err = float(jnp.max(jnp.abs(out - ref)))
    assert jnp.allclose(out, ref, atol=2e-2, rtol=2e-2), max_err

    print("KERNEL_OK")
</pallas_src>

<mosaic_0001>
module attributes {stable_mosaic.version = 11 : i64} {
  func.func @_upcatconv_kernel(%arg0: i32, %arg1: memref<72x128xf32, #tpu.memory_space<vmem>>, %arg2: memref<384x128xbf16, #tpu.memory_space<vmem>>, %arg3: memref<384x128xbf16, #tpu.memory_space<vmem>>, %arg4: memref<1x128xf32, #tpu.memory_space<vmem>>, %arg5: memref<1x128xf32, #tpu.memory_space<vmem>>, %arg6: memref<72x128xf32, #tpu.memory_space<vmem>>, %arg7: memref<72x128xf32, #tpu.memory_space<vmem>>) attributes {dimension_semantics = [#tpu.dimension_semantics<parallel>], iteration_bounds = array<i64: 2>, scalar_prefetch = 0 : i64, scratch_operands = 1 : i64, tpu.core_type = #tpu.core_type<tc>, window_params = [{transform_indices = @transform_0, window_bounds = array<i64: 72, 128>}, {pipeline_mode = #tpu.pipeline_mode<synchronous>, transform_indices = @transform_1, window_bounds = array<i64: 384, 128>}, {pipeline_mode = #tpu.pipeline_mode<synchronous>, transform_indices = @transform_2, window_bounds = array<i64: 384, 128>}, {pipeline_mode = #tpu.pipeline_mode<synchronous>, transform_indices = @transform_3, window_bounds = array<i64: 1, 128>}, {pipeline_mode = #tpu.pipeline_mode<synchronous>, transform_indices = @transform_4, window_bounds = array<i64: 1, 128>}, {transform_indices = @transform_5, window_bounds = array<i64: 72, 128>}]} {
    %c0 = arith.constant 0 : index
    %c0_0 = arith.constant 0 : index
    %0 = vector.load %arg1[%c0, %c0_0] : memref<72x128xf32, #tpu.memory_space<vmem>>, vector<70x128xf32>
    %c1 = arith.constant 1 : index
    %c0_1 = arith.constant 0 : index
    %1 = vector.load %arg1[%c1, %c0_1] : memref<72x128xf32, #tpu.memory_space<vmem>>, vector<70x128xf32>
    %c2 = arith.constant 2 : index
    %c0_2 = arith.constant 0 : index
    %2 = vector.load %arg1[%c2, %c0_2] : memref<72x128xf32, #tpu.memory_space<vmem>>, vector<70x128xf32>
    %3 = tpu.concatenate %0, %1, %2 in 1 : vector<70x128xf32>, vector<70x128xf32>, vector<70x128xf32> -> vector<70x384xf32>
    %4 = arith.truncf %3 : vector<70x384xf32> to vector<70x384xbf16>
    %c0_3 = arith.constant 0 : index
    %c0_4 = arith.constant 0 : index
    %5 = vector.load %arg2[%c0_3, %c0_4] : memref<384x128xbf16, #tpu.memory_space<vmem>>, vector<384x128xbf16>
    %cst = arith.constant dense<0.000000e+00> : vector<70x128xf32>
    %6 = tpu.matmul %4, %5, %cst {dimension_numbers = #tpu.dot_dimension_numbers<[1], [0], [0], [1], [0, 0, 1, 1], [], []>} : vector<70x384xbf16>, vector<384x128xbf16>, vector<70x128xf32> -> vector<70x128xf32>
    %c0_5 = arith.constant 0 : index
    %c0_6 = arith.constant 0 : index
    %7 = vector.load %arg4[%c0_5, %c0_6] : memref<1x128xf32, #tpu.memory_space<vmem>>, vector<1x128xf32>
    %8 = vector.broadcast %7 : vector<1x128xf32> to vector<70x128xf32>
    %9 = arith.addf %6, %8 : vector<70x128xf32>
    %cst_7 = arith.constant 2.000000e-01 : f32
    %10 = vector.broadcast %cst_7 : f32 to vector<70x128xf32>
    %11 = arith.mulf %10, %9 : vector<70x128xf32>
    %12 = arith.maximumf %9, %11 : vector<70x128xf32>
    %c1_8 = arith.constant 1 : index
    %c0_9 = arith.constant 0 : index
    %13 = vector.load %arg7[%c1_8, %c0_9] : memref<72x128xf32, #tpu.memory_space<vmem>>, vector<70x128xf32>
    tpu.vector_store %arg7[%c1_8, %c0_9], %12 {strides = array<i32>} : memref<72x128xf32, #tpu.memory_space<vmem>>, vector<70x128xf32>,
    %cst_10 = arith.constant 0.000000e+00 : f32
    %14 = vector.broadcast %cst_10 : f32 to vector<1x128xf32>
    %c0_11 = arith.constant 0 : index
    %c0_12 = arith.constant 0 : index
    %15 = vector.load %arg7[%c0_11, %c0_12] : memref<72x128xf32, #tpu.memory_space<vmem>>, vector<1x128xf32>
    tpu.vector_store %arg7[%c0_11, %c0_12], %14 {strides = array<i32>} : memref<72x128xf32, #tpu.memory_space<vmem>>, vector<1x128xf32>,
    %c71 = arith.constant 71 : index
    %c0_13 = arith.constant 0 : index
    %16 = vector.load %arg7[%c71, %c0_13] : memref<72x128xf32, #tpu.memory_space<vmem>>, vector<1x128xf32>
    tpu.vector_store %arg7[%c71, %c0_13], %14 {strides = array<i32>} : memref<72x128xf32, #tpu.memory_space<vmem>>, vector<1x128xf32>,
    %cst_14 = arith.constant 0.000000e+00 : f32
    %17 = vector.broadcast %cst_14 : f32 to vector<2x128xf32>
    %c17 = arith.constant 17 : index
    %c0_15 = arith.constant 0 : index
    %18 = vector.load %arg7[%c17, %c0_15] : memref<72x128xf32, #tpu.memory_space<vmem>>, vector<2x128xf32>
    tpu.vector_store %arg7[%c17, %c0_15], %17 {strides = array<i32>} : memref<72x128xf32, #tpu.memory_space<vmem>>, vector<2x128xf32>,
    %c35 = arith.constant 35 : index
    %c0_16 = arith.constant 0 : index
    %19 = vector.load %arg7[%c35, %c0_16] : memref<72x128xf32, #tpu.memory_space<vmem>>, vector<2x128xf32>
    tpu.vector_store %arg7[%c35, %c0_16], %17 {strides = array<i32>} : memref<72x128xf32, #tpu.memory_space<vmem>>, vector<2x128xf32>,
    %c53 = arith.constant 53 : index
    %c0_17 = arith.constant 0 : index
    %20 = vector.load %arg7[%c53, %c0_17] : memref<72x128xf32, #tpu.memory_space<vmem>>, vector<2x128xf32>
    tpu.vector_store %arg7[%c53, %c0_17], %17 {strides = array<i32>} : memref<72x128xf32, #tpu.memory_space<vmem>>, vector<2x128xf32>,
    %c0_18 = arith.constant 0 : index
    %c0_19 = arith.constant 0 : index
    %21 = vector.load %arg7[%c0_18, %c0_19] : memref<72x128xf32, #tpu.memory_space<vmem>>, vector<70x128xf32>
    %c1_20 = arith.constant 1 : index
    %c0_21 = arith.constant 0 : index
    %22 = vector.load %arg7[%c1_20, %c0_21] : memref<72x128xf32, #tpu.memory_space<vmem>>, vector<70x128xf32>
    %c2_22 = arith.constant 2 : index
    %c0_23 = arith.constant 0 : index
    %23 = vector.load %arg7[%c2_22, %c0_23] : memref<72x128xf32, #tpu.memory_space<vmem>>, vector<70x128xf32>
    %24 = tpu.concatenate %21, %22, %23 in 1 : vector<70x128xf32>, vector<70x128xf32>, vector<70x128xf32> -> vector<70x384xf32>
    %25 = arith.truncf %24 : vector<70x384xf32> to vector<70x384xbf16>
    %c0_24 = arith.constant 0 : index
    %c0_25 = arith.constant 0 : index
    %26 = vector.load %arg3[%c0_24, %c0_25] : memref<384x128xbf16, #tpu.memory_space<vmem>>, vector<384x128xbf16>
    %cst_26 = arith.constant dense<0.000000e+00> : vector<70x128xf32>
    %27 = tpu.matmul %25, %26, %cst_26 {dimension_numbers = #tpu.dot_dimension_numbers<[1], [0], [0], [1], [0, 0, 1, 1], [], []>} : vector<70x384xbf16>, vector<384x128xbf16>, vector<70x128xf32> -> vector<70x128xf32>
    %c0_27 = arith.constant 0 : index
    %c0_28 = arith.constant 0 : index
    %28 = vector.load %arg5[%c0_27, %c0_28] : memref<1x128xf32, #tpu.memory_space<vmem>>, vector<1x128xf32>
    %29 = vector.broadcast %28 : vector<1x128xf32> to vector<70x128xf32>
    %30 = arith.addf %27, %29 : vector<70x128xf32>
    %cst_29 = arith.constant 2.000000e-01 : f32
    %31 = vector.broadcast %cst_29 : f32 to vector<70x128xf32>
    %32 = arith.mulf %31, %30 : vector<70x128xf32>
    %33 = arith.maximumf %30, %32 : vector<70x128xf32>
    %c0_30 = arith.constant 0 : index
    %c0_31 = arith.constant 0 : index
    %34 = vector.load %arg6[%c0_30, %c0_31] : memref<72x128xf32, #tpu.memory_space<vmem>>, vector<70x128xf32>
    tpu.vector_store %arg6[%c0_30, %c0_31], %33 {strides = array<i32>} : memref<72x128xf32, #tpu.memory_space<vmem>>, vector<70x128xf32>,
    %cst_32 = arith.constant 0.000000e+00 : f32
    %35 = vector.broadcast %cst_32 : f32 to vector<2x128xf32>
    %c70 = arith.constant 70 : index
    %c0_33 = arith.constant 0 : index
    %36 = vector.load %arg6[%c70, %c0_33] : memref<72x128xf32, #tpu.memory_space<vmem>>, vector<2x128xf32>
    tpu.vector_store %arg6[%c70, %c0_33], %35 {strides = array<i32>} : memref<72x128xf32, #tpu.memory_space<vmem>>, vector<2x128xf32>,
    return
  }
  func.func @transform_0(%arg0: i32) -> (i32, i32) {
    %c0_i32 = arith.constant 0 : i32
    %c0_i32_0 = arith.constant 0 : i32
    return %arg0, %c0_i32 : i32, i32
  }
  func.func @transform_1(%arg0: i32) -> (i32, i32) {
    %c0_i32 = arith.constant 0 : i32
    %c0_i32_0 = arith.constant 0 : i32
    %c0_i32_1 = arith.constant 0 : i32
    return %c0_i32, %c0_i32_0 : i32, i32
  }
  func.func @transform_2(%arg0: i32) -> (i32, i32) {
    %c0_i32 = arith.constant 0 : i32
    %c0_i32_0 = arith.constant 0 : i32
    %c0_i32_1 = arith.constant 0 : i32
    return %c0_i32, %c0_i32_0 : i32, i32
  }
  func.func @transform_3(%arg0: i32) -> (i32, i32) {
    %c0_i32 = arith.constant 0 : i32
    %c0_i32_0 = arith.constant 0 : i32
    %c0_i32_1 = arith.constant 0 : i32
    return %c0_i32, %c0_i32_0 : i32, i32
  }
  func.func @transform_4(%arg0: i32) -> (i32, i32) {
    %c0_i32 = arith.constant 0 : i32
    %c0_i32_0 = arith.constant 0 : i32
    %c0_i32_1 = arith.constant 0 : i32
    return %c0_i32, %c0_i32_0 : i32, i32
  }
  func.func @transform_5(%arg0: i32) -> (i32, i32) {
    %c0_i32 = arith.constant 0 : i32
    %c0_i32_0 = arith.constant 0 : i32
    return %arg0, %c0_i32 : i32, i32
  }
}

</mosaic_0001>

<bundles_post_ra>
// kernel: tile.23
= control target key start
LH: loop header
LB: loop body
LE: loop exit
PB: predicated region body
PF: predicated region fallthrough
CT: control target
= control target key end

     0   :  { %s28_s0 = inlined_call_operand.vmem [shape: f32[8], index: 0, kind: input, shape index: {}]   ;;  %s29_s1 = inlined_call_operand.vmem [shape: f32[16,8], index: 1, kind: output, shape index: {}]  }
   0x1   :  { %v4_v0 = vld [vmem:[%s28_s0] ss:$0 sm:$0xff] }
   0x2   :  { %5 = vst [vmem:[%s29_s1] sm:$0xff] %v4_v0  ;;  %8 = vst [vmem:[%s29_s1 + $0x8] sm:$0xff] %v4_v0 }

// kernel: tile.24
= control target key start
LH: loop header
LB: loop body
LE: loop exit
PB: predicated region body
PF: predicated region fallthrough
CT: control target
= control target key end

     0   :  { %s131_s10 = smov 120   ;;  %s132_s11 = smov 104   ;;  %vm3_vm0 = vcmask 64512   ;;  %vm9_vm1 = vcmask 1048512   ;;  %vm15_vm2 = vcmask 982912   ;;  %vm21_vm3 = vcmask 917312   ;;  %s207_s0 = inlined_call_operand.vmem [shape: f32[16,8], index: 0, kind: input, shape index: {}]   ;;  %s208_s1 = inlined_call_operand.vmem [shape: f32[1,128], index: 1, kind: output, shape index: {}]  }
   0x1   :  { %v101_v0 = vld [vmem:[%s207_s0 + $0xf] sm:$0x1]   ;;  %v103_v1 = vld [vmem:[%s207_s0 + $0xd] sm:$0x1]   ;;  %v102_v2 = vld [vmem:[%s207_s0 + $0xe] sm:$0x1]  }
   0x2   :  { %7 = vrot.lane.b32.xlu0 %v101_v0, %s131_s10  ;;  %19 = vrot.lane.b32.xlu1 %v103_v1, %s132_s11  ;;  %v104_v3 = vld [vmem:[%s207_s0 + $0xc] sm:$0x1]   ;;  %s133_s16 = smov 112   ;;  %s134_s17 = smov 96   ;;  %v105_v4 = vld [vmem:[%s207_s0 + $0xb] sm:$0x1]  }
   0x3   :  { %v106_v5 = vld [vmem:[%s207_s0 + $0xa] sm:$0x1]   ;;  %v2_v6 = vld [vmem:[%s207_s0] sm:$0x1]   ;;  %s135_s24 = smov 88   ;;  %s136_s25 = smov 80  }
   0x4   :  { %4 = vst.msk [vmem:[#allocation0] sm:$0x1] %vm3_vm0, %v2_v6   ;;  %v107_v7 = vld [vmem:[%s207_s0 + $0x9] sm:$0x1]   ;;  %v108_v8 = vld [vmem:[%s207_s0 + $0x8] sm:$0x1]  }
   0x5   :  { %s137_s30 = smov 72   ;;  %s138_s2 = smov 64   ;;  %v109_v9 = vld [vmem:[%s207_s0 + $0x7] sm:$0x1]   ;;  %v110_v10 = vld [vmem:[%s207_s0 + $0x6] sm:$0x1]  }
   0x6   :  { %13 = vrot.lane.b32.xlu0 %v102_v2, %s133_s16  ;;  %25 = vrot.lane.b32.xlu1 %v104_v3, %s134_s17  ;;  %s139_s7 = smov 56   ;;  %s140_s8 = smov 48   ;;  %v111_v11 = vld [vmem:[%s207_s0 + $0x5] sm:$0x1]   ;;  %v112_v12 = vld [vmem:[%s207_s0 + $0x4] sm:$0x1]  }
   0x7   :  { %s141_s13 = smov 40   ;;  %s142_s14 = smov 32   ;;  %v113_v13 = vld [vmem:[%s207_s0 + $0x3] sm:$0x1]   ;;  %v114_v14 = vld [vmem:[%s207_s0 + $0x2] sm:$0x1]  }
   0x8   :  { %s143_s19 = smov 24   ;;  %s144_s20 = smov 16   ;;  %v115_v15 = vld [vmem:[%s207_s0 + $0x1] sm:$0x1]   ;;  %vm27_vm4 = vcmask 851712   ;;  %vm33_vm5 = vcmask 786112  }
   0x9   :  { %s145_s0 = smov 8   ;;  %vm39_vm6 = vcmask 720512   ;;  %vm45_vm7 = vcmask 654912   ;;  %vm51_vm8 = vcmask 589312   ;;  %vm57_vm9 = vcmask 523712  }
   0xa   :  { %31 = vrot.lane.b32.xlu0 %v105_v4, %s135_s24  ;;  %37 = vrot.lane.b32.xlu1 %v106_v5, %s136_s25  ;;  %vm63_vm10 = vcmask 458112   ;;  %vm69_vm11 = vcmask 392512   ;;  %vm75_vm12 = vcmask 326912   ;;  %vm81_vm13 = vcmask 261312  }
   0xb   :  { %vm87_vm14 = vcmask 195712   ;;  %vm93_vm15 = vcmask 130112  }
   0xe   :  { %43 = vrot.lane.b32.xlu0 %v107_v7, %s137_s30  ;;  %49 = vrot.lane.b32.xlu1 %v108_v8, %s138_s2 }
  0x12   :  { %55 = vrot.lane.b32.xlu0 %v109_v9, %s139_s7  ;;  %61 = vrot.lane.b32.xlu1 %v110_v10, %s140_s8 }
  0x16   :  { %67 = vrot.lane.b32.xlu0 %v111_v11, %s141_s13  ;;  %73 = vrot.lane.b32.xlu1 %v112_v12, %s142_s14 }
  0x1a   :  { %79 = vrot.lane.b32.xlu0 %v113_v13, %s143_s19  ;;  %85 = vrot.lane.b32.xlu1 %v114_v14, %s144_s20 }
  0x1e   :  { %91 = vrot.lane.b32.xlu0 %v115_v15, %s145_s0 }
  0x74   :  { %v8_v16 = vpop.permute.xlu0 %7   ;;  %v20_v17 = vpop.permute.xlu1 %19  }
  0x75   :  { %10 = vst.msk [vmem:[#allocation0] sm:$0x1] %vm9_vm1, %v8_v16  }
  0x78   :  { %v14_v18 = vpop.permute.xlu0 %13   ;;  %v26_v19 = vpop.permute.xlu1 %25  }
  0x79   :  { %16 = vst.msk [vmem:[#allocation0] sm:$0x1] %vm15_vm2, %v14_v18  }
  0x7a   :  { %22 = vst.msk [vmem:[#allocation0] sm:$0x1] %vm21_vm3, %v20_v17  }
  0x7b   :  { %28 = vst.msk [vmem:[#allocation0] sm:$0x1] %vm27_vm4, %v26_v19  }
  0x7c   :  { %v32_v20 = vpop.permute.xlu0 %31   ;;  %v38_v21 = vpop.permute.xlu1 %37  }
  0x7d   :  { %34 = vst.msk [vmem:[#allocation0] sm:$0x1] %vm33_vm5, %v32_v20  }
  0x7e   :  { %40 = vst.msk [vmem:[#allocation0] sm:$0x1] %vm39_vm6, %v38_v21  }
  0x80   :  { %v44_v22 = vpop.permute.xlu0 %43   ;;  %v50_v23 = vpop.permute.xlu1 %49  }
  0x81   :  { %46 = vst.msk [vmem:[#allocation0] sm:$0x1] %vm45_vm7, %v44_v22  }
  0x82   :  { %52 = vst.msk [vmem:[#allocation0] sm:$0x1] %vm51_vm8, %v50_v23  }
  0x84   :  { %v56_v24 = vpop.permute.xlu0 %55   ;;  %v62_v25 = vpop.permute.xlu1 %61  }
  0x85   :  { %58 = vst.msk [vmem:[#allocation0] sm:$0x1] %vm57_vm9, %v56_v24  }
  0x86   :  { %64 = vst.msk [vmem:[#allocation0] sm:$0x1] %vm63_vm10, %v62_v25  }
  0x88   :  { %v68_v26 = vpop.permute.xlu0 %67   ;;  %v74_v27 = vpop.permute.xlu1 %73  }
  0x89   :  { %70 = vst.msk [vmem:[#allocation0] sm:$0x1] %vm69_vm11, %v68_v26  }
  0x8a   :  { %76 = vst.msk [vmem:[#allocation0] sm:$0x1] %vm75_vm12, %v74_v27  }
  0x8c   :  { %v80_v28 = vpop.permute.xlu0 %79   ;;  %v86_v29 = vpop.permute.xlu1 %85  }
  0x8d   :  { %82 = vst.msk [vmem:[#allocation0] sm:$0x1] %vm81_vm13, %v80_v28  }
  0x8e   :  { %88 = vst.msk [vmem:[#allocation0] sm:$0x1] %vm87_vm14, %v86_v29  }
  0x90   :  { %v92_v30 = vpop.permute.xlu0 %91  }
  0x91   :  { %94 = vst.msk [vmem:[#allocation0] sm:$0x1] %vm93_vm15, %v92_v30  }
  0x98   :  { %v98_v31 = vld [vmem:[#allocation0] sm:$0x1] }
  0x99   :  { %100 = vst [vmem:[%s208_s1] sm:$0x1] %v98_v31 }

// kernel: up_cat_conv_forward.1
= control target key start
LH: loop header
LB: loop body
LE: loop exit
PB: predicated region body
PF: predicated region fallthrough
CT: control target
= control target key end

     0   :  { %s1462_s18 = smov 0   ;;  %s1741_s0 = inlined_call_operand.vmem [shape: f32[144,128], index: 0, kind: input, shape index: {}]   ;;  %s1742_s1 = inlined_call_operand.vmem [shape: bf16[384,128], index: 1, kind: input, shape index: {}]   ;;  %s1743_s2 = inlined_call_operand.vmem [shape: bf16[384,128], index: 2, kind: input, shape index: {}]   ;;  %s1744_s3 = inlined_call_operand.vmem [shape: f32[1,128], index: 3, kind: input, shape index: {}]   ;;  %s1745_s4 = inlined_call_operand.vmem [shape: f32[1,128], index: 4, kind: input, shape index: {}]   ;;  %s1746_s5 = inlined_call_operand.vmem [shape: f32[144,128], index: 5, kind: output, shape index: {}]  }
   0x1 LB: > { %s1115_s19 = sadd.s32 4294967295, %s1428_s18   ;;  %p1119_p0 = scmp.ge.s32.totalorder %s1428_s18, 1  ;;  %s1428_s18 = sphi %s1462_s18, %s15_s18  }
   0x2   : > { %p188_p1 = scmp.lt.s32.totalorder %s1428_s18, 3 }
   0x4   : > { %p189_p2 = pnand %p1119_p0, %p188_p1 }
   0x5   : > { %v1374_v0 = vld [vmem:[%s1742_s1 + $0x40] sm:$0xff] (!%p189_p2)   ;;  %v1430_v2 = vmov (!%p189_p2), 0.0   ;;  %v1377_v4 = vld [vmem:[%s1742_s1 + $0x48] sm:$0xff] (!%p189_p2)   ;;  %vm1431_vm0 = vmmov (!%p189_p2), 0   ;;  %s216_s7 = smul.u32 (!%p189_p2), 9, %s1115_s19  ;;  %v1380_v7 = vld [vmem:[%s1742_s1 + $0x50] sm:$0xff] (!%p189_p2)  }
   0x6   : > { %192 = sbr.rel (%p189_p2) target bundleno = 531 (0x213), region = 40  ;;  %v1375_v1 = vld [vmem:[%s1742_s1] sm:$0xff] (!%p189_p2)   ;;  %1292 = vmatprep.subr.bf16.mxu1 (!%p189_p2), %v1430_v2  ;;  %641 = vst [vmem:[#allocation2] sm:$0x1] (!%p189_p2), %v1430_v2  ;;  %642 = vst [vmem:[#allocation2 + $0x47] sm:$0x1] (!%p189_p2), %v1430_v2  ;;  %1174 = vmatprep.subr.bf16.mxu0 (!%p189_p2), %v1374_v0 }
   0x7   : > { %v1376_v3 = vld [vmem:[%s1742_s1 + $0x80] sm:$0xff] (!%p189_p2)   ;;  %1175 = vmatpush3.bf16.msra.mxu0 (!%p189_p2), %v1375_v1  ;;  %1308 = vmatprep.mubr.msk.bf16.mxu1 (!%p189_p2), %vm1431_vm0, %v1430_v2  ;;  %v1378_v5 = vld [vmem:[%s1742_s1 + $0x8] sm:$0xff] (!%p189_p2)   ;;  %v1381_v8 = vld [vmem:[%s1742_s1 + $0x10] sm:$0xff] (!%p189_p2)   ;;  %p217_p3 = scmp.lt.s32.totalorder (!%p189_p2), %s216_s7, 17 }
   0x8   : > { %1293 = vmatpush3.bf16.msra.mxu1 (!%p189_p2), %v1376_v3  ;;  %1176 = vmatprep.subr.bf16.mxu0 (!%p189_p2), %v1377_v4  ;;  %v1379_v6 = vld [vmem:[%s1742_s1 + $0x88] sm:$0xff] (!%p189_p2)   ;;  %v1382_v9 = vld [vmem:[%s1742_s1 + $0x90] sm:$0xff] (!%p189_p2)   ;;  %v1383_v10 = vld [vmem:[%s1742_s1 + $0x58] sm:$0xff] (!%p189_p2)  }
   0x9   : > { %1294 = vmatprep.subr.bf16.mxu1 (!%p189_p2), %v1430_v2  ;;  %v1384_v11 = vld [vmem:[%s1742_s1 + $0x18] sm:$0xff] (!%p189_p2)   ;;  %v1386_v13 = vld [vmem:[%s1742_s1 + $0x60] sm:$0xff] (!%p189_p2)   ;;  %v1389_v16 = vld [vmem:[%s1742_s1 + $0x68] sm:$0xff] (!%p189_p2)  }
   0xa   : > { %v1385_v12 = vld [vmem:[%s1742_s1 + $0x98] sm:$0xff] (!%p189_p2)   ;;  %v1387_v14 = vld [vmem:[%s1742_s1 + $0x20] sm:$0xff] (!%p189_p2)   ;;  %v1390_v17 = vld [vmem:[%s1742_s1 + $0x28] sm:$0xff] (!%p189_p2)  }
   0xb   : > { %1177 = vmatpush3.bf16.msra.mxu0 (!%p189_p2), %v1378_v5  ;;  %v1388_v15 = vld [vmem:[%s1742_s1 + $0xa0] sm:$0xff] (!%p189_p2)   ;;  %v1391_v18 = vld [vmem:[%s1742_s1 + $0xa8] sm:$0xff] (!%p189_p2)   ;;  %v1392_v19 = vld [vmem:[%s1742_s1 + $0x70] sm:$0xff] (!%p189_p2)  }
   0xc   : > { %1295 = vmatpush3.bf16.msra.mxu1 (!%p189_p2), %v1379_v6  ;;  %1178 = vmatprep.subr.bf16.mxu0 (!%p189_p2), %v1380_v7  ;;  %v1393_v20 = vld [vmem:[%s1742_s1 + $0x30] sm:$0xff] (!%p189_p2)   ;;  %v1395_v24 = vld [vmem:[%s1742_s1 + $0x78] sm:$0xff] (!%p189_p2)   ;;  %v1398_v39 = vld [vmem:[%s1743_s2 + $0x40] sm:$0xff] (!%p189_p2)  }
   0xd   : > { %1296 = vmatprep.subr.bf16.mxu1 %v1430_v2  ;;  %s1748_s7 = smov (!%p217_p3, %s216_s7), 17  ;;  %v1394_v23 = vld [vmem:[%s1742_s1 + $0xb0] sm:$0xff]   ;;  %v1396_v26 = vld [vmem:[%s1742_s1 + $0x38] sm:$0xff]   ;;  %v1399_v44 = vld [vmem:[%s1743_s2] sm:$0xff]  }
   0xe   : > { %s1120_s29 = sshll.u32 %s1748_s7, 3  ;;  %v1397_v27 = vld [vmem:[%s1742_s1 + $0xb8] sm:$0xff]   ;;  %v1400_v45 = vld [vmem:[%s1743_s2 + $0x48] sm:$0xff]   ;;  %v1402_v47 = vld [vmem:[%s1743_s2 + $0x80] sm:$0xff]  }
   0xf   : > { %1179 = vmatpush3.bf16.msra.mxu0 %v1381_v8  ;;  %s1544_s14 = scalar_lea.vmem %s1741_s0, %s1120_s29  ;;  %v1401_v46 = vld [vmem:[%s1743_s2 + $0x8] sm:$0xff]   ;;  %v1403_v49 = vld [vmem:[%s1743_s2 + $0x50] sm:$0xff]   ;;  %s1711_s11 = scalar_lea.vmem %s1746_s5, %s1120_s29 }
  0x10   : > { %1297 = vmatpush3.bf16.msra.mxu1 %v1382_v9  ;;  %1180 = vmatprep.subr.bf16.mxu0 %v1383_v10  ;;  %v238_v21 = vld [vmem:[%s1544_s14 + $0x1] sm:$0xff]  ;;  %v239_v22 = vld [vmem:[%s1544_s14 + $0x9] sm:$0xff]  ;;  %v240_v32 = vld [vmem:[%s1544_s14 + $0x11] sm:$0xff]  ;;  %1058 = vst [vmem:[%s1711_s11 + $0x46] sm:$0x3] %v1430_v2 }
  0x11   : > { %1298 = vmatprep.subr.bf16.mxu1 %v1430_v2  ;;  %v257_v25 = vpack.c.bf16 %v239_v22, %v238_v21  ;;  %v229_v28 = vld [vmem:[%s1544_s14] sm:$0xff]  ;;  %v230_v29 = vld [vmem:[%s1544_s14 + $0x8] sm:$0xff]  ;;  %v231_v37 = vld [vmem:[%s1544_s14 + $0x10] sm:$0xff] }
  0x12   : > { %v247_v30 = vld [vmem:[%s1544_s14 + $0x2] sm:$0xff]  ;;  %v248_v31 = vld [vmem:[%s1544_s14 + $0xa] sm:$0xff]  ;;  %v241_v33 = vld [vmem:[%s1544_s14 + $0x19] sm:$0xff]  ;;  %v256_v34 = vpack.c.bf16 %v230_v29, %v229_v28 }
  0x13   : > { %1181 = vmatpush3.bf16.msra.mxu0 %v1384_v11  ;;  %502 = vmatprep.mubr.bf16.mxu0 %v257_v25  ;;  %v258_v35 = vpack.c.bf16 %v248_v31, %v247_v30  ;;  %v260_v36 = vpack.c.bf16 %v241_v33, %v240_v32  ;;  %v232_v38 = vld [vmem:[%s1544_s14 + $0x18] sm:$0xff]  ;;  %v242_v42 = vld [vmem:[%s1544_s14 + $0x21] sm:$0xff]  ;;  %v243_v43 = vld [vmem:[%s1544_s14 + $0x29] sm:$0xff] }
  0x14   : > { %1299 = vmatpush3.bf16.msra.mxu1 %v1385_v12  ;;  %1182 = vmatprep.subr.bf16.mxu0 %v1386_v13  ;;  %v249_v40 = vld [vmem:[%s1544_s14 + $0x12] sm:$0xff]  ;;  %v250_v41 = vld [vmem:[%s1544_s14 + $0x1a] sm:$0xff]  ;;  %v259_v48 = vpack.c.bf16 %v232_v38, %v231_v37  ;;  %v263_v51 = vpack.c.bf16 %v243_v43, %v242_v42  ;;  %v1405_v53 = vld [vmem:[%s1743_s2 + $0x88] sm:$0xff]  }
  0x15   : > { %1300 = vmatprep.subr.bf16.mxu1 %v1430_v2  ;;  %v261_v50 = vpack.c.bf16 %v250_v41, %v249_v40  ;;  %v1404_v52 = vld [vmem:[%s1743_s2 + $0x10] sm:$0xff]   ;;  %v233_v54 = vld [vmem:[%s1544_s14 + $0x20] sm:$0xff]  ;;  %v234_v55 = vld [vmem:[%s1544_s14 + $0x28] sm:$0xff] }
  0x16   : > { %v251_v56 = vld [vmem:[%s1544_s14 + $0x22] sm:$0xff]  ;;  %v252_v57 = vld [vmem:[%s1544_s14 + $0x2a] sm:$0xff]  ;;  %v245_v59 = vld [vmem:[%s1544_s14 + $0x39] sm:$0xff]  ;;  %v262_v60 = vpack.c.bf16 %v234_v55, %v233_v54 }
  0x17   : > { %1183 = vmatpush3.bf16.msra.mxu0 %v1387_v14  ;;  %v244_v58 = vld [vmem:[%s1544_s14 + $0x31] sm:$0xff]  ;;  %v264_v61 = vpack.c.bf16 %v252_v57, %v251_v56  ;;  %v254_v3 = vld [vmem:[%s1544_s14 + $0x3a] sm:$0xff]  ;;  %v255_v9 = vld [vmem:[%s1544_s14 + $0x42] sm:$0x3f] }
  0x18   : > { %1301 = vmatpush3.bf16.msra.mxu1 %v1388_v15  ;;  %1184 = vmatprep.subr.bf16.mxu0 %v1389_v16  ;;  %v266_v62 = vpack.c.bf16 %v245_v59, %v244_v58  ;;  %v235_v63 = vld [vmem:[%s1544_s14 + $0x30] sm:$0xff]  ;;  %v236_v0 = vld [vmem:[%s1544_s14 + $0x38] sm:$0xff]  ;;  %v246_v4 = vld [vmem:[%s1544_s14 + $0x41] sm:$0x3f]  ;;  %v270_v11 = vpack.c.bf16 %v255_v9, %v255_v9 }
  0x19   : > { %1302 = vmatprep.subr.bf16.mxu1 %v1430_v2  ;;  %v253_v1 = vld [vmem:[%s1544_s14 + $0x32] sm:$0xff]  ;;  %v265_v5 = vpack.c.bf16 %v236_v0, %v235_v63  ;;  %v269_v7 = vpack.c.bf16 %v246_v4, %v246_v4  ;;  %v237_v8 = vld [vmem:[%s1544_s14 + $0x40] sm:$0x3f] }
  0x1a   : > { %v267_v6 = vpack.c.bf16 %v254_v3, %v253_v1  ;;  %v268_v10 = vpack.c.bf16 %v237_v8, %v237_v8  ;;  %v1406_v12 = vld [vmem:[%s1743_s2 + $0x58] sm:$0xff]   ;;  %v1408_v14 = vld [vmem:[%s1743_s2 + $0x90] sm:$0xff]   ;;  %v1409_v15 = vld [vmem:[%s1743_s2 + $0x60] sm:$0xff]  }
  0x1b   : > { %1185 = vmatpush3.bf16.msra.mxu0 %v1390_v17  ;;  %v1407_v13 = vld [vmem:[%s1743_s2 + $0x18] sm:$0xff]   ;;  %v1410_v16 = vld [vmem:[%s1743_s2 + $0x20] sm:$0xff]   ;;  %v1415_v21 = vld [vmem:[%s1743_s2 + $0x70] sm:$0xff]  }
  0x1c   : > { %1303 = vmatpush3.bf16.msra.mxu1 %v1391_v18  ;;  %1186 = vmatprep.subr.bf16.mxu0 %v1392_v19  ;;  %v1411_v17 = vld [vmem:[%s1743_s2 + $0x98] sm:$0xff]   ;;  %v1412_v18 = vld [vmem:[%s1743_s2 + $0x68] sm:$0xff]   ;;  %v1416_v22 = vld [vmem:[%s1743_s2 + $0x30] sm:$0xff]  }
  0x1d   : > { %1304 = vmatprep.subr.bf16.mxu1 %v1430_v2  ;;  %v1413_v19 = vld [vmem:[%s1743_s2 + $0x28] sm:$0xff]   ;;  %v1419_v25 = vld [vmem:[%s1743_s2 + $0x38] sm:$0xff]   ;;  %v1684_v30 = vld [vmem:[%s1744_s3] ss:$0 sm:$0xff] }
  0x1f   : > { %1187 = vmatpush3.bf16.msra.mxu0 %v1393_v20  ;;  %v1414_v20 = vld [vmem:[%s1743_s2 + $0xa0] sm:$0xff]  }
  0x20   : > { %1305 = vmatpush3.bf16.msra.mxu1 %v1394_v23  ;;  %1188 = vmatprep.subr.bf16.mxu0 %v1395_v24  ;;  %v1417_v23 = vld [vmem:[%s1743_s2 + $0xa8] sm:$0xff]   ;;  %v1418_v24 = vld [vmem:[%s1743_s2 + $0x78] sm:$0xff]  }
  0x21   : > { %1306 = vmatprep.subr.bf16.mxu1 %v1430_v2 }
  0x23   : > { %1189 = vmatpush3.bf16.msra.mxu0 %v1396_v26  ;;  %v1420_v26 = vld [vmem:[%s1743_s2 + $0xb0] sm:$0xff]  }
  0x24   : > { %1307 = vmatpush3.bf16.msra.mxu1 %v1397_v27  ;;  %1233 = vmatprep.subr.bf16.mxu0 %v1398_v39  ;;  %v1421_v27 = vld [vmem:[%s1743_s2 + $0xb8] sm:$0xff]  }
  0x25   : > { %1328 = vmatprep.subr.bf16.mxu1 %v1430_v2 }
  0x26   : > { %503 = vmatmul.mubr.bf16.vlgmr.msra.gmra.mrb[0].mxu0 %v256_v34 }
  0x27   : > { %1309 = vmatmul.mubr.bf16.vlgmr.msra.gmra.mrb[0].mxu1 %v258_v35  ;;  %510 = vmatprep.mubr.bf16.mxu0 %v260_v36 }
  0x28   : > { %1312 = vmatprep.mubr.msk.bf16.mxu1 %vm1431_vm0, %v1430_v2  ;;  %1234 = vmatpush3.bf16.msra.mxu0 %v1399_v44 }
  0x29   : > { %1235 = vmatprep.subr.bf16.mxu0 %v1400_v45  ;;  %1329 = vmatpush3.bf16.msra.mxu1 %v1402_v47 }
  0x2a   : > { %1330 = vmatprep.subr.bf16.mxu1 %v1430_v2 }
  0x2c   : > { %1236 = vmatpush3.bf16.msra.mxu0 %v1401_v46 }
  0x2d   : > { %1237 = vmatprep.subr.bf16.mxu0 %v1403_v49  ;;  %1331 = vmatpush3.bf16.msra.mxu1 %v1405_v53 }
  0x2e   : > { %511 = vmatmul.mubr.bf16.gmra.mrb[4].mxu0 %v259_v48  ;;  %1332 = vmatprep.subr.bf16.mxu1 %v1430_v2 }
  0x2f   : > { %1313 = vmatmul.mubr.bf16.gmra.mrb[4].mxu1 %v261_v50  ;;  %518 = vmatprep.mubr.bf16.mxu0 %v263_v51 }
  0x30   : > { %1316 = vmatprep.mubr.msk.bf16.mxu1 %vm1431_vm0, %v1430_v2  ;;  %1238 = vmatpush3.bf16.msra.mxu0 %v1404_v52 }
  0x31   : > { %1239 = vmatprep.subr.bf16.mxu0 %v1406_v12  ;;  %1333 = vmatpush3.bf16.msra.mxu1 %v1408_v14 }
  0x32   : > { %1334 = vmatprep.subr.bf16.mxu1 %v1430_v2 }
  0x34   : > { %1240 = vmatpush3.bf16.msra.mxu0 %v1407_v13 }
  0x35   : > { %1241 = vmatprep.subr.bf16.mxu0 %v1409_v15  ;;  %1335 = vmatpush3.bf16.msra.mxu1 %v1411_v17 }
  0x36   : > { %519 = vmatmul.mubr.bf16.gmra.mrb[8].mxu0 %v262_v60  ;;  %1336 = vmatprep.subr.bf16.mxu1 %v1430_v2 }
  0x37   : > { %1317 = vmatmul.mubr.bf16.gmra.mrb[8].mxu1 %v264_v61  ;;  %526 = vmatprep.mubr.bf16.mxu0 %v266_v62 }
  0x38   : > { %1320 = vmatprep.mubr.msk.bf16.mxu1 %vm1431_vm0, %v1430_v2  ;;  %1242 = vmatpush3.bf16.msra.mxu0 %v1410_v16 }
  0x39   : > { %1243 = vmatprep.subr.bf16.mxu0 %v1412_v18  ;;  %1337 = vmatpush3.bf16.msra.mxu1 %v1414_v20 }
  0x3a   : > { %1338 = vmatprep.subr.bf16.mxu1 %v1430_v2 }
  0x3c   : > { %1244 = vmatpush3.bf16.msra.mxu0 %v1413_v19 }
  0x3d   : > { %1245 = vmatprep.subr.bf16.mxu0 %v1415_v21  ;;  %1339 = vmatpush3.bf16.msra.mxu1 %v1417_v23 }
  0x3e   : > { %527 = vmatmul.mubr.bf16.gmra.mrb[12].mxu0 %v265_v5  ;;  %1340 = vmatprep.subr.bf16.mxu1 %v1430_v2 }
  0x3f   : > { %1321 = vmatmul.mubr.bf16.gmra.mrb[12].mxu1 %v267_v6  ;;  %534 = vmatprep.mubr.bf16.mxu0 %v269_v7 }
  0x40   : > { %1324 = vmatprep.mubr.msk.bf16.mxu1 %vm1431_vm0, %v1430_v2  ;;  %1246 = vmatpush3.bf16.msra.mxu0 %v1416_v22 }
  0x41   : > { %1247 = vmatprep.subr.bf16.mxu0 %v1418_v24  ;;  %1341 = vmatpush3.bf16.msra.mxu1 %v1420_v26 }
  0x42   : > { %1342 = vmatprep.subr.bf16.mxu1 %v1430_v2 }
  0x44   : > { %1248 = vmatpush3.bf16.msra.mxu0 %v1419_v25 }
  0x45   : > { %1343 = vmatpush3.bf16.msra.mxu1 %v1421_v27 }
  0x46   : > { %535 = vmatmul.mubr.bf16.gmra.mrb[16].mxu0 %v268_v10 }
  0x47   : > { %1325 = vmatmul.mubr.bf16.gmra.mrb[16].mxu1 %v270_v11 }
  0x48   : > { %1344 = vmatprep.mubr.msk.bf16.mxu1 %vm1431_vm0, %v1430_v2 }
  0xf9   : > { %v1190_v28 = vpop.f32.mrb[0].mxu0 }
  0xfa   : > { %v1191_v29 = vpop.f32.mrb[1].mxu0  ;;  %v576_v31 = vpop.f32.mrb[0].mxu1 }
  0xfb   : > { %v1192_v32 = vadd.f32 %v1191_v29, %v1190_v28  ;;  %v1193_v33 = vpop.f32.mrb[2].mxu0  ;;  %v1310_v34 = vpop.f32.mrb[1].mxu1 }
  0xfc   : > { %v1194_v35 = vpop.f32.mrb[3].mxu0  ;;  %v579_v36 = vpop.f32.mrb[2].mxu1 }
  0xfd   : > { %v505_v37 = vadd.f32 %v1192_v32, %v1684_v30  ;;  %v1195_v38 = vadd.f32 %v1194_v35, %v1193_v33  ;;  %v1311_v39 = vpop.f32.mrb[3].mxu1 }
  0xff   : > { %v577_v40 = vadd.f32 %v576_v31, %v505_v37  ;;  %v508_v41 = vadd.f32 %v1195_v38, %v1684_v30 }
 0x101   : > { %v614_v42 = vmul.f32 0.2, %v577_v40  ;;  %v580_v43 = vadd.f32 %v579_v36, %v508_v41  ;;  %v1196_v44 = vpop.f32.mrb[4].mxu0 }
 0x102   : > { %v1197_v45 = vpop.f32.mrb[5].mxu0  ;;  %v584_v46 = vpop.f32.mrb[4].mxu1 }
 0x103   : > { %v623_v47 = vmax.f32 %v577_v40, %v614_v42  ;;  %v615_v48 = vmul.f32 0.2, %v580_v43  ;;  %v1198_v49 = vadd.f32 %v1197_v45, %v1196_v44  ;;  %v1199_v50 = vpop.f32.mrb[6].mxu0  ;;  %v1314_v51 = vpop.f32.mrb[5].mxu1 }
 0x104   : > { %v1200_v52 = vpop.f32.mrb[7].mxu0  ;;  %v587_v53 = vpop.f32.mrb[6].mxu1 }
 0x105   : > { %632 = vst [vmem:[#allocation2 + $0x1] sm:$0xff] %v623_v47  ;;  %v624_v54 = vmax.f32 %v580_v43, %v615_v48  ;;  %v513_v55 = vadd.f32 %v1198_v49, %v1684_v30  ;;  %v1201_v56 = vadd.f32 %v1200_v52, %v1199_v50  ;;  %v1315_v57 = vpop.f32.mrb[7].mxu1 }
 0x107   : > { %633 = vst [vmem:[#allocation2 + $0x9] sm:$0xff] %v624_v54  ;;  %v585_v58 = vadd.f32 %v584_v46, %v513_v55  ;;  %v516_v59 = vadd.f32 %v1201_v56, %v1684_v30  ;;  %v674_v60 = vpack.c.bf16 %v624_v54, %v623_v47 }
 0x109   : > { %v616_v61 = vmul.f32 0.2, %v585_v58  ;;  %v588_v62 = vadd.f32 %v587_v53, %v516_v59  ;;  %v1202_v63 = vpop.f32.mrb[8].mxu0  ;;  %919 = vmatprep.mubr.bf16.mxu0 %v674_v60 }
 0x10a   : > { %v1203_v0 = vpop.f32.mrb[9].mxu0  ;;  %v592_v1 = vpop.f32.mrb[8].mxu1 }
 0x10b   : > { %v625_v3 = vmax.f32 %v585_v58, %v616_v61  ;;  %v617_v4 = vmul.f32 0.2, %v588_v62  ;;  %v1204_v5 = vadd.f32 %v1203_v0, %v1202_v63  ;;  %v1205_v6 = vpop.f32.mrb[10].mxu0  ;;  %v1318_v7 = vpop.f32.mrb[9].mxu1 }
 0x10c   : > { %v1206_v8 = vpop.f32.mrb[11].mxu0  ;;  %v595_v9 = vpop.f32.mrb[10].mxu1  ;;  %v646_v14 = vld [vmem:[#allocation2] sm:$0xff] }
 0x10d   : > { %634 = vst [vmem:[#allocation2 + $0x11] sm:$0xff] %v625_v3  ;;  %v626_v10 = vmax.f32 %v588_v62, %v617_v4  ;;  %v1207_v11 = vadd.f32 %v1206_v8, %v1205_v6  ;;  %v521_v12 = vadd.f32 %v1204_v5, %v1684_v30  ;;  %v1319_v13 = vpop.f32.mrb[11].mxu1 }
 0x10e   : > { %643 = vst [vmem:[#allocation2 + $0x11] sm:$0x3] %v1430_v2  ;;  %v647_v15 = vld [vmem:[#allocation2 + $0x8] sm:$0xff] }
 0x10f   : > { %635 = vst [vmem:[#allocation2 + $0x19] sm:$0xff] %v626_v10  ;;  %v593_v16 = vadd.f32 %v592_v1, %v521_v12  ;;  %v524_v17 = vadd.f32 %v1207_v11, %v1684_v30  ;;  %v673_v18 = vpack.c.bf16 %v647_v15, %v646_v14  ;;  %v664_v32 = vld [vmem:[#allocation2 + $0x2] sm:$0xff] }
 0x111   : > { %v618_v19 = vmul.f32 0.2, %v593_v16  ;;  %v596_v20 = vadd.f32 %v595_v9, %v524_v17  ;;  %v1208_v21 = vpop.f32.mrb[12].mxu0  ;;  %920 = vmatmul.mubr.bf16.vlgmr.msra.gmra.mrb[20].mxu0 %v673_v18 }
 0x112   : > { %v1209_v22 = vpop.f32.mrb[13].mxu0  ;;  %v600_v23 = vpop.f32.mrb[12].mxu1 }
 0x113   : > { %v627_v24 = vmax.f32 %v593_v16, %v618_v19  ;;  %v619_v25 = vmul.f32 0.2, %v596_v20  ;;  %v1210_v26 = vadd.f32 %v1209_v22, %v1208_v21  ;;  %v1211_v27 = vpop.f32.mrb[14].mxu0  ;;  %v1322_v28 = vpop.f32.mrb[13].mxu1 }
 0x114   : > { %v1212_v29 = vpop.f32.mrb[15].mxu0  ;;  %v603_v31 = vpop.f32.mrb[14].mxu1 }
 0x115   : > { %636 = vst [vmem:[#allocation2 + $0x21] sm:$0xff] %v627_v24  ;;  %v628_v33 = vmax.f32 %v596_v20, %v619_v25  ;;  %v1213_v34 = vadd.f32 %v1212_v29, %v1211_v27  ;;  %v529_v35 = vadd.f32 %v1210_v26, %v1684_v30  ;;  %v1323_v36 = vpop.f32.mrb[15].mxu1  ;;  %v665_v37 = vld [vmem:[#allocation2 + $0xa] sm:$0xff] }
 0x116   : > { %v657_v38 = vld [vmem:[#allocation2 + $0x11] sm:$0xff]  ;;  %644 = vst [vmem:[#allocation2 + $0x23] sm:$0x3] %v1430_v2  ;;  %v675_v40 = vpack.c.bf16 %v665_v37, %v664_v32 }
 0x117   : > { %v648_v39 = vld [vmem:[#allocation2 + $0x10] sm:$0xff]  ;;  %v677_v41 = vpack.c.bf16 %v626_v10, %v657_v38  ;;  %v649_v42 = vld [vmem:[#allocation2 + $0x18] sm:$0xff]  ;;  %637 = vst [vmem:[#allocation2 + $0x29] sm:$0xff] %v628_v33  ;;  %v601_v43 = vadd.f32 %v600_v23, %v529_v35  ;;  %v532_v44 = vadd.f32 %v1213_v34, %v1684_v30 }
 0x118   : > { %v676_v45 = vpack.c.bf16 %v649_v42, %v648_v39  ;;  %1345 = vmatmul.mubr.bf16.vlgmr.msra.gmra.mrb[20].mxu1 %v675_v40  ;;  %v666_v58 = vld [vmem:[#allocation2 + $0x12] sm:$0xff] }
 0x119   : > { %927 = vmatprep.mubr.bf16.mxu0 %v677_v41  ;;  %v620_v46 = vmul.f32 0.2, %v601_v43  ;;  %v604_v47 = vadd.f32 %v603_v31, %v532_v44  ;;  %v1214_v48 = vpop.f32.mrb[16].mxu0  ;;  %1348 = vmatprep.mubr.msk.bf16.mxu1 %vm1431_vm0, %v1430_v2  ;;  %v1718_v31 = vld [vmem:[%s1745_s4] ss:$0 sm:$0xff] }
 0x11a   : > { %928 = vmatmul.mubr.bf16.gmra.mrb[24].mxu0 %v676_v45  ;;  %v1215_v49 = vpop.f32.mrb[17].mxu0  ;;  %v608_v50 = vpop.f32.mrb[16].mxu1 }
 0x11b   : > { %v629_v51 = vmax.f32 %v601_v43, %v620_v46  ;;  %v621_v52 = vmul.f32 0.2, %v604_v47  ;;  %v1216_v53 = vadd.f32 %v1215_v49, %v1214_v48  ;;  %v1217_v54 = vpop.f32.mrb[18].mxu0  ;;  %v1326_v55 = vpop.f32.mrb[17].mxu1 }
 0x11c   : > { %v1218_v56 = vpop.f32.mrb[19].mxu0  ;;  %v611_v57 = vpop.f32.mrb[18].mxu1  ;;  %v667_v59 = vld [vmem:[#allocation2 + $0x1a] sm:$0xff] }
 0x11d   : > { %638 = vst [vmem:[#allocation2 + $0x31] sm:$0xff] %v629_v51  ;;  %v630_v60 = vmax.f32 %v604_v47, %v621_v52  ;;  %v537_v61 = vadd.f32 %v1216_v53, %v1684_v30  ;;  %v1327_v62 = vpop.f32.mrb[19].mxu1  ;;  %v678_v63 = vpack.c.bf16 %v667_v59, %v666_v58  ;;  %v659_v0 = vld [vmem:[#allocation2 + $0x21] sm:$0xff] }
 0x11e   : > { %v650_v1 = vld [vmem:[#allocation2 + $0x20] sm:$0xff]  ;;  %645 = vst [vmem:[#allocation2 + $0x35] sm:$0x3] %v1430_v2  ;;  %v680_v3 = vpack.c.bf16 %v628_v33, %v659_v0  ;;  %v651_v4 = vld [vmem:[#allocation2 + $0x28] sm:$0xff] }
 0x11f   : > { %639 = vst [vmem:[#allocation2 + $0x39] sm:$0xff] %v630_v60  ;;  %v609_v5 = vadd.f32 %v608_v50, %v537_v61  ;;  %v679_v6 = vpack.c.bf16 %v651_v4, %v650_v1  ;;  %v668_v30 = vld [vmem:[#allocation2 + $0x22] sm:$0xff] }
 0x120   : > { %1349 = vmatmul.mubr.bf16.gmra.mrb[24].mxu1 %v678_v63  ;;  %935 = vmatprep.mubr.bf16.mxu0 %v680_v3 }
 0x121   : > { %v622_v7 = vmul.f32 0.2, %v609_v5  ;;  %1352 = vmatprep.mubr.msk.bf16.mxu1 %vm1431_vm0, %v1430_v2 }
 0x122   : > { %936 = vmatmul.mubr.bf16.gmra.mrb[28].mxu0 %v679_v6 }
 0x123   : > { %v631_v8 = vmax.f32 %v609_v5, %v622_v7 }
 0x124   : > { %v669_v9 = vld [vmem:[#allocation2 + $0x2a] sm:$0xff] }
 0x125   : > { %640 = vst [vmem:[#allocation2 + $0x41] sm:$0x3f] %v631_v8  ;;  %v681_v10 = vpack.c.bf16 %v669_v9, %v668_v30  ;;  %v661_v11 = vld [vmem:[#allocation2 + $0x31] sm:$0xff] }
 0x126   : > { %v652_v12 = vld [vmem:[#allocation2 + $0x30] sm:$0xff]  ;;  %v683_v13 = vpack.c.bf16 %v630_v60, %v661_v11  ;;  %v653_v14 = vld [vmem:[#allocation2 + $0x38] sm:$0xff] }
 0x127   : > { %v682_v15 = vpack.c.bf16 %v653_v14, %v652_v12  ;;  %v670_v16 = vld [vmem:[#allocation2 + $0x32] sm:$0xff] }
 0x128   : > { %1353 = vmatmul.mubr.bf16.gmra.mrb[28].mxu1 %v681_v10  ;;  %943 = vmatprep.mubr.bf16.mxu0 %v683_v13 }
 0x129   : > { %1356 = vmatprep.mubr.msk.bf16.mxu1 %vm1431_vm0, %v1430_v2 }
 0x12a   : > { %944 = vmatmul.mubr.bf16.gmra.mrb[32].mxu0 %v682_v15 }
 0x12c   : > { %v663_v17 = vld [vmem:[#allocation2 + $0x41] sm:$0x3f] }
 0x12d   : > { %v671_v18 = vld [vmem:[#allocation2 + $0x3a] sm:$0xff]  ;;  %v686_v20 = vpack.c.bf16 %v663_v17, %v663_v17  ;;  %v672_v23 = vld [vmem:[#allocation2 + $0x42] sm:$0x3f] }
 0x12e   : > { %v654_v19 = vld [vmem:[#allocation2 + $0x40] sm:$0x3f]  ;;  %v684_v21 = vpack.c.bf16 %v671_v18, %v670_v16  ;;  %v687_v24 = vpack.c.bf16 %v672_v23, %v672_v23 }
 0x12f   : > { %951 = vmatprep.mubr.bf16.mxu0 %v686_v20  ;;  %v685_v22 = vpack.c.bf16 %v654_v19, %v654_v19 }
 0x130   : > { %1357 = vmatmul.mubr.bf16.gmra.mrb[32].mxu1 %v684_v21 }
 0x131   : > { %1360 = vmatprep.mubr.msk.bf16.mxu1 %vm1431_vm0, %v1430_v2 }
 0x132   : > { %952 = vmatmul.mubr.bf16.gmra.mrb[36].mxu0 %v685_v22 }
 0x138   : > { %1361 = vmatmul.mubr.bf16.gmra.mrb[36].mxu1 %v687_v24 }
 0x1e4   : > { %v1249_v25 = vpop.f32.mrb[20].mxu0 }
 0x1e5   : > { %v1250_v26 = vpop.f32.mrb[21].mxu0 }
 0x1e6   : > { %v1251_v27 = vadd.f32 %v1250_v26, %v1249_v25  ;;  %v1252_v28 = vpop.f32.mrb[22].mxu0 }
 0x1e7   : > { %v1253_v29 = vpop.f32.mrb[23].mxu0 }
 0x1e8   : > { %v1254_v32 = vadd.f32 %v1253_v29, %v1252_v28  ;;  %v922_v33 = vadd.f32 %v1251_v27, %v1718_v31 }
 0x1ea   : > { %v925_v2 = vadd.f32 %v1254_v32, %v1718_v31 }
 0x1eb   : > { %v993_v34 = vpop.f32.mrb[20].mxu1 }
 0x1ec   : > { %v994_v35 = vadd.f32 %v993_v34, %v922_v33  ;;  %v1346_v36 = vpop.f32.mrb[21].mxu1 }
 0x1ed   : > { %v1255_v37 = vpop.f32.mrb[24].mxu0  ;;  %v996_v38 = vpop.f32.mrb[22].mxu1 }
 0x1ee   : > { %v1256_v39 = vpop.f32.mrb[25].mxu0  ;;  %v1031_v40 = vmul.f32 0.2, %v994_v35  ;;  %v997_v41 = vadd.f32 %v996_v38, %v925_v2  ;;  %v1347_v43 = vpop.f32.mrb[23].mxu1 }
 0x1ef   : > { %v1257_v42 = vadd.f32 %v1256_v39, %v1255_v37  ;;  %v1258_v44 = vpop.f32.mrb[26].mxu0 }
 0x1f0   : > { %v1259_v45 = vpop.f32.mrb[27].mxu0  ;;  %v1040_v46 = vmax.f32 %v994_v35, %v1031_v40  ;;  %v1032_v47 = vmul.f32 0.2, %v997_v41 }
 0x1f1   : > { %v1260_v48 = vadd.f32 %v1259_v45, %v1258_v44  ;;  %v930_v50 = vadd.f32 %v1257_v42, %v1718_v31 }
 0x1f2   : > { %1049 = vst [vmem:[%s1711_s11] sm:$0xff] %v1040_v46  ;;  %v1041_v49 = vmax.f32 %v997_v41, %v1032_v47 }
 0x1f3   : > { %v1001_v51 = vpop.f32.mrb[24].mxu1  ;;  %v933_v55 = vadd.f32 %v1260_v48, %v1718_v31 }
 0x1f4   : > { %1050 = vst [vmem:[%s1711_s11 + $0x8] sm:$0xff] %v1041_v49  ;;  %v1002_v52 = vadd.f32 %v1001_v51, %v930_v50  ;;  %v1350_v53 = vpop.f32.mrb[25].mxu1 }
 0x1f5   : > { %v1261_v54 = vpop.f32.mrb[28].mxu0  ;;  %v1004_v56 = vpop.f32.mrb[26].mxu1 }
 0x1f6   : > { %v1262_v57 = vpop.f32.mrb[29].mxu0  ;;  %v1033_v58 = vmul.f32 0.2, %v1002_v52  ;;  %v1005_v59 = vadd.f32 %v1004_v56, %v933_v55  ;;  %v1351_v61 = vpop.f32.mrb[27].mxu1 }
 0x1f7   : > { %v1263_v60 = vadd.f32 %v1262_v57, %v1261_v54  ;;  %v1264_v62 = vpop.f32.mrb[30].mxu0 }
 0x1f8   : > { %v1265_v63 = vpop.f32.mrb[31].mxu0  ;;  %v1042_v0 = vmax.f32 %v1002_v52, %v1033_v58  ;;  %v1034_v1 = vmul.f32 0.2, %v1005_v59 }
 0x1f9   : > { %v1266_v3 = vadd.f32 %v1265_v63, %v1264_v62  ;;  %v938_v5 = vadd.f32 %v1263_v60, %v1718_v31 }
 0x1fa   : > { %1051 = vst [vmem:[%s1711_s11 + $0x10] sm:$0xff] %v1042_v0  ;;  %v1043_v4 = vmax.f32 %v1005_v59, %v1034_v1 }
 0x1fb   : > { %v1009_v6 = vpop.f32.mrb[28].mxu1  ;;  %v941_v9 = vadd.f32 %v1266_v3, %v1718_v31 }
 0x1fc   : > { %1052 = vst [vmem:[%s1711_s11 + $0x18] sm:$0xff] %v1043_v4  ;;  %v1010_v7 = vadd.f32 %v1009_v6, %v938_v5  ;;  %v1354_v8 = vpop.f32.mrb[29].mxu1 }
 0x1fd   : > { %v1267_v30 = vpop.f32.mrb[32].mxu0  ;;  %v1012_v10 = vpop.f32.mrb[30].mxu1 }
 0x1fe   : > { %v1268_v11 = vpop.f32.mrb[33].mxu0  ;;  %v1035_v12 = vmul.f32 0.2, %v1010_v7  ;;  %v1013_v13 = vadd.f32 %v1012_v10, %v941_v9  ;;  %v1355_v15 = vpop.f32.mrb[31].mxu1 }
 0x1ff   : > { %v1269_v14 = vadd.f32 %v1268_v11, %v1267_v30  ;;  %v1270_v16 = vpop.f32.mrb[34].mxu0 }
 0x200   : > { %v1271_v17 = vpop.f32.mrb[35].mxu0  ;;  %v1044_v18 = vmax.f32 %v1010_v7, %v1035_v12  ;;  %v1036_v19 = vmul.f32 0.2, %v1013_v13 }
 0x201   : > { %v1272_v20 = vadd.f32 %v1271_v17, %v1270_v16  ;;  %v946_v22 = vadd.f32 %v1269_v14, %v1718_v31 }
 0x202   : > { %1053 = vst [vmem:[%s1711_s11 + $0x20] sm:$0xff] %v1044_v18  ;;  %v1045_v21 = vmax.f32 %v1013_v13, %v1036_v19 }
 0x203   : > { %v1017_v23 = vpop.f32.mrb[32].mxu1  ;;  %v949_v27 = vadd.f32 %v1272_v20, %v1718_v31 }
 0x204   : > { %1054 = vst [vmem:[%s1711_s11 + $0x28] sm:$0xff] %v1045_v21  ;;  %v1018_v24 = vadd.f32 %v1017_v23, %v946_v22  ;;  %v1358_v25 = vpop.f32.mrb[33].mxu1 }
 0x205   : > { %v1273_v26 = vpop.f32.mrb[36].mxu0  ;;  %v1020_v28 = vpop.f32.mrb[34].mxu1 }
 0x206   : > { %v1274_v29 = vpop.f32.mrb[37].mxu0  ;;  %v1037_v32 = vmul.f32 0.2, %v1018_v24  ;;  %v1021_v33 = vadd.f32 %v1020_v28, %v949_v27  ;;  %v1359_v35 = vpop.f32.mrb[35].mxu1 }
 0x207   : > { %v1275_v34 = vadd.f32 %v1274_v29, %v1273_v26  ;;  %v1276_v36 = vpop.f32.mrb[38].mxu0 }
 0x208   : > { %v1277_v37 = vpop.f32.mrb[39].mxu0  ;;  %v1046_v2 = vmax.f32 %v1018_v24, %v1037_v32  ;;  %v1038_v38 = vmul.f32 0.2, %v1021_v33 }
 0x209   : > { %v954_v40 = vadd.f32 %v1275_v34, %v1718_v31 }
 0x20a   : > { %1055 = vst [vmem:[%s1711_s11 + $0x30] sm:$0xff] %v1046_v2  ;;  %v1047_v39 = vmax.f32 %v1021_v33, %v1038_v38 }
 0x20b   : > { %v1025_v41 = vpop.f32.mrb[36].mxu1 }
 0x20c   : > { %1056 = vst [vmem:[%s1711_s11 + $0x38] sm:$0xff] %v1047_v39  ;;  %v1026_v42 = vadd.f32 %v1025_v41, %v954_v40  ;;  %v1362_v43 = vpop.f32.mrb[37].mxu1 }
 0x20d   : > { %v1028_v44 = vpop.f32.mrb[38].mxu1 }
 0x20e   : > { %v1039_v45 = vmul.f32 0.2, %v1026_v42  ;;  %v1363_v46 = vpop.f32.mrb[39].mxu1 }
 0x210   : > { %v1048_v47 = vmax.f32 %v1026_v42, %v1039_v45 }
 0x212   : > { %1057 = vst [vmem:[%s1711_s11 + $0x40] sm:$0x3f] %v1048_v47 }
 0x213 PF: > { %s15_s18 = sadd.s32 1, %s1428_s18  }
 0x214   : > { %p12_p4 = scmp.ge.s32.totalorder %s15_s18, 4  }
 0x216   :  { %14 = sbr.rel (!%p12_p4) target bundleno = 1 (0x1), region = 70 }

</bundles_post_ra>
